<compile_context>
chip_gen: v7x
topology: tpu7x:2x2x1
jax: 0.10.0
libtpu: 0.0.40
codegen_flags: <defaults>
</compile_context>

<pallas_src>
import functools

import jax
import jax.numpy as jnp
import numpy as np
from jax.experimental import pallas as pl
from jax.experimental.pallas import tpu as pltpu


# ------------------------------ fused kernel ------------------------------- #

def _decoder_kernel(*refs, num_deconv):
    """refs: z, w_in, b_in, [M_i, Mb_i] * num_deconv, w_out, b_out, o_ref."""
    z_ref, win_ref, bin_ref = refs[:3]
    rest = refs[3:]
    o_ref = rest[-1]
    f32 = jnp.float32

    # Fused (residual dense | level dense1) on z, one matmul + bias + ReLU.
    x = jnp.maximum(
        jnp.dot(z_ref[...], win_ref[...], preferred_element_type=f32)
        + bin_ref[...], 0.0)

    # Each deconv layer = one banded matmul + bias + ReLU (level cols carried
    # through by the identity block inside M_i).
    for i in range(num_deconv):
        m_ref = rest[2 * i]
        b_ref = rest[2 * i + 1]
        x = jnp.maximum(
            jnp.dot(x, m_ref[...], preferred_element_type=f32) + b_ref[...], 0.0)

    # Final fused (final_dense ; level_dense2) matmul + combined bias.
    wout_ref = rest[2 * num_deconv]
    bout_ref = rest[2 * num_deconv + 1]
    out = jnp.dot(x, wout_ref[...], preferred_element_type=f32) + bout_ref[...]
    o_ref[...] = out.astype(o_ref.dtype)


def timevae_decoder_forward(packed, z, *, seq_len, feat_dim):
    B = z.shape[0]
    num_deconv = len(packed["deconv_mats"])
    args = [z, packed["w_in"], packed["b_in"]]
    for m, b in packed["deconv_mats"]:
        args += [m, b]
    args += [packed["w_out"], packed["b_out"]]

    out_flat = pl.pallas_call(
        functools.partial(_decoder_kernel, num_deconv=num_deconv),
        out_shape=jax.ShapeDtypeStruct((B, seq_len * feat_dim), jnp.float32),
        in_specs=[pl.BlockSpec(memory_space=pltpu.MemorySpace.VMEM)] * len(args),
        out_specs=pl.BlockSpec(memory_space=pltpu.MemorySpace.VMEM),
    )(*args)
    return out_flat.reshape(B, seq_len, feat_dim)


# -------------------- parameters: raw (PyTorch-style) ----------------------- #

def init_raw_params(key, seq_len, feat_dim, hidden_layer_sizes, latent_dim,
                    encoder_last_dense_dim):
    n_deconv = len(hidden_layer_sizes)
    keys = jax.random.split(key, 2 * (n_deconv + 4))
    kit = iter(keys)

    def lin(fan_in, fan_out):
        bound = 1.0 / float(np.sqrt(fan_in))
        w = jax.random.uniform(next(kit), (fan_out, fan_in), jnp.float32,
                               -bound, bound)
        b = jax.random.uniform(next(kit), (fan_out,), jnp.float32, -bound, bound)
        return w, b

    raw = {}
    raw["level_dense1"] = lin(latent_dim, feat_dim)
    raw["level_dense2"] = lin(feat_dim, feat_dim)
    raw["dense"] = lin(latent_dim, encoder_last_dense_dim)

    deconvs = []
    in_ch = hidden_layer_sizes[-1]
    out_channels = list(reversed(hidden_layer_sizes[:-1])) + [feat_dim]
    for oc in out_channels:
        bound = 1.0 / float(np.sqrt(in_ch * 3))
        w = jax.random.uniform(next(kit), (in_ch, oc, 3), jnp.float32,
                               -bound, bound)
        b = jax.random.uniform(next(kit), (oc,), jnp.float32, -bound, bound)
        deconvs.append((w, b))
        in_ch = oc
    raw["deconvs"] = deconvs

    L = encoder_last_dense_dim // hidden_layer_sizes[-1]
    for _ in range(len(hidden_layer_sizes)):
        L = (L - 1) * 2 - 2 * 1 + 3 + 1          # == 2 * L
    raw["L_final"] = L
    raw["final_dense"] = lin(feat_dim * L, seq_len * feat_dim)
    return raw


# ------------------ parameters: packed for the fused kernel ----------------- #

def _deconv_as_banded_matrix_np(w, b, L):
    """Fold ConvTranspose1d(k=3,s=2,p=1,op=1) on an NLC-flat (L*Cin,) row into
    one matmul: returns M (L*Cin, 2L*Cout) and bias row (2L*Cout,) in numpy."""
    w = np.asarray(w)
    cin, cout, _ = w.shape
    w0, w1, w2 = w[:, :, 0], w[:, :, 1], w[:, :, 2]
    m = np.zeros((L * cin, 2 * L * cout), np.float32)
    for i in range(L):
        m[i * cin:(i + 1) * cin, (2 * i) * cout:(2 * i + 1) * cout] = w1
        m[i * cin:(i + 1) * cin, (2 * i + 1) * cout:(2 * i + 2) * cout] = w2
        if i + 1 < L:
            m[(i + 1) * cin:(i + 2) * cin,
              (2 * i + 1) * cout:(2 * i + 2) * cout] = w0
    bias = np.tile(np.asarray(b), 2 * L).astype(np.float32)
    return m, bias


def pack_params(raw, *, seq_len, feat_dim, hidden_layer_sizes,
                encoder_last_dense_dim):
    F = feat_dim
    lw1, lb1 = raw["level_dense1"]            # (F, latent), (F,)
    lw2, lb2 = raw["level_dense2"]            # (F, F), (F,)
    dw, db = raw["dense"]                     # (E, latent), (E,)

    # Fused input weight: [residual dense | level dense1] -> (latent, E + F).
    w_in = np.concatenate([np.asarray(dw).T, np.asarray(lw1).T],
                          axis=1).astype(np.float32)
    b_in = np.concatenate([np.asarray(db), np.asarray(lb1)]
                          ).astype(np.float32).reshape(1, -1)

    # Deconv banded matrices, each extended with an identity block that carries
    # the F (already non-negative) level activations unchanged through ReLU.
    mats = []
    L = encoder_last_dense_dim // hidden_layer_sizes[-1]
    for (w, b) in raw["deconvs"]:
        m, bias = _deconv_as_banded_matrix_np(w, b, L)
        rows, cols = m.shape
        m_ext = np.zeros((rows + F, cols + F), np.float32)
        m_ext[:rows, :cols] = m
        m_ext[rows:, cols:] = np.eye(F, dtype=np.float32)
        bias_ext = np.concatenate(
            [bias, np.zeros((F,), np.float32)]).reshape(1, -1)
        mats.append((jnp.asarray(m_ext), jnp.asarray(bias_ext)))
        L = 2 * L

    # Final weight: NCL channel-major flatten folded into a column permutation
    # of final_w, then level_dense2 (tiled across seq_len) vstacked underneath;
    # the two output biases are pre-summed.
    fw, fb = raw["final_dense"]               # (S*F, F*L_final)
    L_final = raw["L_final"]
    fw_np = np.asarray(fw)
    fw_nlc = fw_np.reshape(fw_np.shape[0], F, L_final)
    fw_nlc = np.transpose(fw_nlc, (0, 2, 1)).reshape(fw_np.shape[0], -1)
    fw_t = fw_nlc.T.astype(np.float32)                       # (L_final*F, S*F)
    lvl_w2_tiled = np.tile(np.asarray(lw2).T, (1, seq_len)).astype(np.float32)
    w_out = np.concatenate([fw_t, lvl_w2_tiled], axis=0)     # (L_f*F + F, S*F)
    b_out = (np.asarray(fb) + np.tile(np.asarray(lb2), seq_len)
             ).astype(np.float32).reshape(1, -1)

    return {
        "w_in": jnp.asarray(w_in), "b_in": jnp.asarray(b_in),
        "deconv_mats": mats,
        "w_out": jnp.asarray(w_out), "b_out": jnp.asarray(b_out),
    }


# --------------------------- pure-JAX reference ----------------------------- #

def _convtranspose1d_ref(x_ncl, w, b):
    # ConvTranspose1d(k=3, s=2, p=1, op=1) via dilated conv with flipped kernel.
    w_conv = jnp.transpose(jnp.flip(w, axis=2), (1, 0, 2))  # (Cout, Cin, 3)
    out = jax.lax.conv_general_dilated(
        x_ncl, w_conv, window_strides=(1,), padding=[(1, 2)],
        lhs_dilation=(2,), dimension_numbers=("NCH", "OIH", "NCH"))
    return out + b[None, :, None]


def timevae_decoder_ref(raw, z, *, seq_len, feat_dim, hidden_layer_sizes):
    B = z.shape[0]
    lw1, lb1 = raw["level_dense1"]
    lw2, lb2 = raw["level_dense2"]
    lvl = jax.nn.relu(z @ lw1.T + lb1) @ lw2.T + lb2
    outputs = lvl[:, None, :] * jnp.ones((1, seq_len, 1), jnp.float32)

    dw, db = raw["dense"]
    x = jax.nn.relu(z @ dw.T + db)
    x = x.reshape(B, -1, hidden_layer_sizes[-1]).transpose(0, 2, 1)   # NCL
    for (w, b) in raw["deconvs"]:
        x = jax.nn.relu(_convtranspose1d_ref(x, w, b))
    x = x.reshape(B, -1)                                              # flatten(1)
    fw, fb = raw["final_dense"]
    res = (x @ fw.T + fb).reshape(B, seq_len, feat_dim)
    return outputs + res


# ---------------------------------- main ------------------------------------ #

if __name__ == "__main__":
    seq_len = 8
    feat_dim = 4
    hidden_layer_sizes = (16, 32)
    latent_dim = 8
    encoder_last_dense_dim = 64
    batch = 2

    key = jax.random.PRNGKey(0)
    pkey, zkey = jax.random.split(key)
    raw = init_raw_params(pkey, seq_len, feat_dim, hidden_layer_sizes,
                          latent_dim, encoder_last_dense_dim)
    packed = pack_params(raw, seq_len=seq_len, feat_dim=feat_dim,
                         hidden_layer_sizes=hidden_layer_sizes,
                         encoder_last_dense_dim=encoder_last_dense_dim)
    z = jax.random.normal(zkey, (batch, latent_dim), jnp.float32)

    out = timevae_decoder_forward(packed, z, seq_len=seq_len, feat_dim=feat_dim)
    out = jax.block_until_ready(out)

    ref = timevae_decoder_ref(raw, z, seq_len=seq_len, feat_dim=feat_dim,
                              hidden_layer_sizes=hidden_layer_sizes)

    assert out.shape == (batch, seq_len, feat_dim), out.shape
    max_err = float(jnp.max(jnp.abs(out - ref)))
    assert jnp.allclose(out, ref, atol=1e-4, rtol=1e-4), max_err
    print("KERNEL_OK")
</pallas_src>

<mosaic_0001>
module attributes {stable_mosaic.version = 11 : i64} {
  func.func @_decoder_kernel(%arg0: memref<2x8xf32, #tpu.memory_space<vmem>>, %arg1: memref<8x68xf32, #tpu.memory_space<vmem>>, %arg2: memref<1x68xf32, #tpu.memory_space<vmem>>, %arg3: memref<68x68xf32, #tpu.memory_space<vmem>>, %arg4: memref<1x68xf32, #tpu.memory_space<vmem>>, %arg5: memref<68x36xf32, #tpu.memory_space<vmem>>, %arg6: memref<1x36xf32, #tpu.memory_space<vmem>>, %arg7: memref<36x32xf32, #tpu.memory_space<vmem>>, %arg8: memref<1x32xf32, #tpu.memory_space<vmem>>, %arg9: memref<2x32xf32, #tpu.memory_space<vmem>>) attributes {dimension_semantics = [], scalar_prefetch = 0 : i64, scratch_operands = 0 : i64, tpu.core_type = #tpu.core_type<tc>} {
    %c0 = arith.constant 0 : index
    %c0_0 = arith.constant 0 : index
    %0 = vector.load %arg0[%c0, %c0_0] : memref<2x8xf32, #tpu.memory_space<vmem>>, vector<2x8xf32>
    %c0_1 = arith.constant 0 : index
    %c0_2 = arith.constant 0 : index
    %1 = vector.load %arg1[%c0_1, %c0_2] : memref<8x68xf32, #tpu.memory_space<vmem>>, vector<8x68xf32>
    %cst = arith.constant dense<0.000000e+00> : vector<2x68xf32>
    %2 = tpu.matmul %0, %1, %cst {dimension_numbers = #tpu.dot_dimension_numbers<[1], [0], [0], [1], [0, 0, 1, 1], [], []>} : vector<2x8xf32>, vector<8x68xf32>, vector<2x68xf32> -> vector<2x68xf32>
    %c0_3 = arith.constant 0 : index
    %c0_4 = arith.constant 0 : index
    %3 = vector.load %arg2[%c0_3, %c0_4] : memref<1x68xf32, #tpu.memory_space<vmem>>, vector<1x68xf32>
    %4 = vector.broadcast %3 : vector<1x68xf32> to vector<2x68xf32>
    %5 = arith.addf %2, %4 : vector<2x68xf32>
    %cst_5 = arith.constant 0.000000e+00 : f32
    %6 = vector.broadcast %cst_5 : f32 to vector<2x68xf32>
    %7 = arith.maximumf %5, %6 : vector<2x68xf32>
    %c0_6 = arith.constant 0 : index
    %c0_7 = arith.constant 0 : index
    %8 = vector.load %arg3[%c0_6, %c0_7] : memref<68x68xf32, #tpu.memory_space<vmem>>, vector<68x68xf32>
    %cst_8 = arith.constant dense<0.000000e+00> : vector<2x68xf32>
    %9 = tpu.matmul %7, %8, %cst_8 {dimension_numbers = #tpu.dot_dimension_numbers<[1], [0], [0], [1], [0, 0, 1, 1], [], []>} : vector<2x68xf32>, vector<68x68xf32>, vector<2x68xf32> -> vector<2x68xf32>
    %c0_9 = arith.constant 0 : index
    %c0_10 = arith.constant 0 : index
    %10 = vector.load %arg4[%c0_9, %c0_10] : memref<1x68xf32, #tpu.memory_space<vmem>>, vector<1x68xf32>
    %11 = vector.broadcast %10 : vector<1x68xf32> to vector<2x68xf32>
    %12 = arith.addf %9, %11 : vector<2x68xf32>
    %cst_11 = arith.constant 0.000000e+00 : f32
    %13 = vector.broadcast %cst_11 : f32 to vector<2x68xf32>
    %14 = arith.maximumf %12, %13 : vector<2x68xf32>
    %c0_12 = arith.constant 0 : index
    %c0_13 = arith.constant 0 : index
    %15 = vector.load %arg5[%c0_12, %c0_13] : memref<68x36xf32, #tpu.memory_space<vmem>>, vector<68x36xf32>
    %cst_14 = arith.constant dense<0.000000e+00> : vector<2x36xf32>
    %16 = tpu.matmul %14, %15, %cst_14 {dimension_numbers = #tpu.dot_dimension_numbers<[1], [0], [0], [1], [0, 0, 1, 1], [], []>} : vector<2x68xf32>, vector<68x36xf32>, vector<2x36xf32> -> vector<2x36xf32>
    %c0_15 = arith.constant 0 : index
    %c0_16 = arith.constant 0 : index
    %17 = vector.load %arg6[%c0_15, %c0_16] : memref<1x36xf32, #tpu.memory_space<vmem>>, vector<1x36xf32>
    %18 = vector.broadcast %17 : vector<1x36xf32> to vector<2x36xf32>
    %19 = arith.addf %16, %18 : vector<2x36xf32>
    %cst_17 = arith.constant 0.000000e+00 : f32
    %20 = vector.broadcast %cst_17 : f32 to vector<2x36xf32>
    %21 = arith.maximumf %19, %20 : vector<2x36xf32>
    %c0_18 = arith.constant 0 : index
    %c0_19 = arith.constant 0 : index
    %22 = vector.load %arg7[%c0_18, %c0_19] : memref<36x32xf32, #tpu.memory_space<vmem>>, vector<36x32xf32>
    %cst_20 = arith.constant dense<0.000000e+00> : vector<2x32xf32>
    %23 = tpu.matmul %21, %22, %cst_20 {dimension_numbers = #tpu.dot_dimension_numbers<[1], [0], [0], [1], [0, 0, 1, 1], [], []>} : vector<2x36xf32>, vector<36x32xf32>, vector<2x32xf32> -> vector<2x32xf32>
    %c0_21 = arith.constant 0 : index
    %c0_22 = arith.constant 0 : index
    %24 = vector.load %arg8[%c0_21, %c0_22] : memref<1x32xf32, #tpu.memory_space<vmem>>, vector<1x32xf32>
    %25 = vector.broadcast %24 : vector<1x32xf32> to vector<2x32xf32>
    %26 = arith.addf %23, %25 : vector<2x32xf32>
    %c0_23 = arith.constant 0 : index
    %c0_24 = arith.constant 0 : index
    %27 = vector.load %arg9[%c0_23, %c0_24] : memref<2x32xf32, #tpu.memory_space<vmem>>, vector<2x32xf32>
    tpu.vector_store %arg9[%c0_23, %c0_24], %26 {strides = array<i32>} : memref<2x32xf32, #tpu.memory_space<vmem>>, vector<2x32xf32>,
    return
  }
}

</mosaic_0001>

<bundles_post_ra>
// kernel: tpu_custom_call.1
= control target key start
LH: loop header
LB: loop body
LE: loop exit
PB: predicated region body
PF: predicated region fallthrough
CT: control target
= control target key end

     0   :  { %vm42_vm0 = vcmask 64512   ;;  %v567_v2 = vmov 0.0   ;;  %vm568_vm1 = vmmov 0   ;;  %v569_v6 = vmov 0.0|0.0   ;;  %s737_s0 = inlined_call_operand.vmem [shape: f32[2,8], index: 0, kind: input, shape index: {}]   ;;  %s738_s1 = inlined_call_operand.vmem [shape: f32[8,68], index: 1, kind: input, shape index: {}]   ;;  %s739_s2 = inlined_call_operand.vmem [shape: f32[1,68], index: 2, kind: input, shape index: {}]   ;;  %s740_s3 = inlined_call_operand.vmem [shape: f32[68,68], index: 3, kind: input, shape index: {}]   ;;  %s741_s4 = inlined_call_operand.vmem [shape: f32[1,68], index: 4, kind: input, shape index: {}]   ;;  %s742_s5 = inlined_call_operand.vmem [shape: f32[68,36], index: 5, kind: input, shape index: {}]   ;;  %s743_s6 = inlined_call_operand.vmem [shape: f32[1,36], index: 6, kind: input, shape index: {}]   ;;  %s744_s7 = inlined_call_operand.vmem [shape: f32[36,32], index: 7, kind: input, shape index: {}]   ;;  %s745_s8 = inlined_call_operand.vmem [shape: f32[1,32], index: 8, kind: input, shape index: {}]   ;;  %s746_s9 = inlined_call_operand.hbm [shape: f32[2,32], index: 9, kind: output, shape index: {}]  }
   0x1   :  { %v34_v0 = vld [vmem:[%s738_s1] sm:$0xff]  ;;  %449 = vmatprep.subr.mxu0 %v567_v2  ;;  %451 = vmatprep.mubr.msk.f32.mxu0 %vm568_vm1, %v567_v2  ;;  %v118_v4 = vld [vmem:[%s740_s3 + $0x8] sm:$0xff]  ;;  %v119_v5 = vld [vmem:[%s740_s3 + $0x10] sm:$0xff] }
   0x2   :  { %v33_v1 = vld [vmem:[%s737_s0] sm:$0x3]  ;;  %450 = vmatpush3.msra.mxu0 %v34_v0  ;;  %509 = vmatprep.subr.bf16.mxu1 %v569_v6  ;;  %v120_v8 = vld [vmem:[%s740_s3 + $0x18] sm:$0xff] }
   0x3   :  { %v117_v3 = vld [vmem:[%s740_s3] sm:$0xff]  ;;  %452 = vmatmul.mubr.msk.f32.vlgmr.msra.gmra.mrb[0].mxu0 %vm42_vm0, %v33_v1  ;;  %472 = vmatprep.mubr.msk.f32.mxu1 %vm568_vm1, %v567_v2 }
   0x4   :  { %v510_v7 = vpack.c.bf16 %v118_v4, %v117_v3 }
   0x5   :  { %14 = vsyncpa [#allocation3], 0  ;;  %v513_v9 = vpack.c.bf16 %v120_v8, %v119_v5  ;;  %521 = vmatprep.subr.bf16.mxu0 %v569_v6  ;;  %v121_v10 = vld [vmem:[%s740_s3 + $0x20] sm:$0xff]  ;;  %v122_v11 = vld [vmem:[%s740_s3 + $0x28] sm:$0xff]  ;;  %493 = vmatprep.mubr.msk.f32.mxu0 %vm568_vm1, %v567_v2  ;;  %vm137_vm2 = vcmask 1043456   ;;  %vm133_vm3 = vcmask 556032  }
   0x6   :  { %511 = vmatpush3.bf16.msra.mxu1 %v510_v7  ;;  %v516_v12 = vpack.c.bf16 %v122_v11, %v121_v10  ;;  %v123_v13 = vld [vmem:[%s740_s3 + $0x30] sm:$0xff]  ;;  %v124_v14 = vld [vmem:[%s740_s3 + $0x38] sm:$0xff]  ;;  %v125_v16 = vld [vmem:[%s740_s3 + $0x40] sm:$0xf]  ;;  %vm317_vm4 = vcmask 293888   ;;  %s570_s16 = smov [#allocation2]  }
   0x7   :  { %512 = vmatprep.subr.bf16.mxu1 %v569_v6  ;;  %v519_v15 = vpack.c.bf16 %v124_v14, %v123_v13  ;;  %v212_v17 = vld [vmem:[%s742_s5] sm:$0xff]  ;;  %v213_v18 = vld [vmem:[%s742_s5 + $0x8] sm:$0xff]  ;;  %v214_v19 = vld [vmem:[%s742_s5 + $0x10] sm:$0xff]  ;;  %s402_s1 = sshll.u32 %s570_s16, 4  ;;  %vm394_vm5 = vcmask 254976   ;;  %s403_s1 = int_to_ptr.vmem [resolvable:$true] %s402_s1 }
   0x8   :  { %v522_v20 = vpack.c.bf16 %v213_v18, %v212_v17  ;;  %v215_v21 = vld [vmem:[%s742_s5 + $0x18] sm:$0xff]  ;;  %v216_v23 = vld [vmem:[%s742_s5 + $0x20] sm:$0xff]  ;;  %v217_v24 = vld [vmem:[%s742_s5 + $0x28] sm:$0xff]  ;;  %p548_p1 = scmp.lt.s32.totalorder %s403_s1, %s403_s1 }
   0x9   :  { %v525_v22 = vpack.c.bf16 %v215_v21, %v214_v19  ;;  %v528_v25 = vpack.c.bf16 %v217_v24, %v216_v23  ;;  %v410_v26 = vld [vmem:[%s739_s2] ss:$0 sm:$0xff]  ;;  %v218_v31 = vld [vmem:[%s742_s5 + $0x30] sm:$0xff]  ;;  %v219_v32 = vld [vmem:[%s742_s5 + $0x38] sm:$0xff] }
   0xa   :  { %514 = vmatpush3.bf16.msra.mxu1 %v513_v9  ;;  %523 = vmatpush3.bf16.msra.mxu0 %v522_v20  ;;  %v531_v33 = vpack.c.bf16 %v219_v32, %v218_v31  ;;  %v220_v34 = vld [vmem:[%s742_s5 + $0x40] sm:$0xf]  ;;  %v306_v36 = vld [vmem:[%s744_s7 + $0x8] sm:$0xff]  ;;  %v307_v43 = vld [vmem:[%s744_s7 + $0x10] sm:$0xff] }
   0xb   :  { %515 = vmatprep.subr.bf16.mxu1 %v569_v6  ;;  %524 = vmatprep.subr.bf16.mxu0 %v569_v6  ;;  %v305_v35 = vld [vmem:[%s744_s7] sm:$0xff]  ;;  %v308_v44 = vld [vmem:[%s744_s7 + $0x18] sm:$0xff] }
   0xc   :  { %v534_v37 = vpack.c.bf16 %v306_v36, %v305_v35  ;;  %v412_v38 = vld [vmem:[%s741_s4] ss:$0 sm:$0xff]  ;;  %v537_v45 = vpack.c.bf16 %v308_v44, %v307_v43 }
   0xd   :  { %v309_v46 = vld [vmem:[%s744_s7 + $0x20] sm:$0xf]  ;;  %s543_s7 = scalar_lea.vmem %s403_s1, 32 }
   0xe   :  { %517 = vmatpush3.bf16.msra.mxu1 %v516_v12  ;;  %526 = vmatpush3.bf16.msra.mxu0 %v525_v22  ;;  %v415_v47 = vld [vmem:[%s743_s6] ss:$0 sm:$0xff]  ;;  %p544_p0 = scmp.ne.s32.totalorder %s403_s1, %s543_s7  ;;  %p549_p2 = scmp.lt.s32.totalorder %s543_s7, %s543_s7 }
   0xf   :  { %518 = vmatprep.subr.bf16.mxu1 %v569_v6  ;;  %527 = vmatprep.subr.bf16.mxu0 %v569_v6  ;;  %v418_v52 = vld [vmem:[%s745_s8] ss:$0 sm:$0xff] }
  0x10   :  { %p550_p3 = por %p549_p2, %p548_p1 }
  0x12   :  { %520 = vmatpush3.bf16.msra.mxu1 %v519_v15  ;;  %529 = vmatpush3.bf16.msra.mxu0 %v528_v25  ;;  %p551_p4 = pnand %p550_p3, %p544_p0 }
  0x13   :  { %470 = vmatprep.subr.mxu1 %v567_v2  ;;  %530 = vmatprep.subr.bf16.mxu0 %v569_v6 }
  0x16   :  { %471 = vmatpush3.msk.msra.mxu1 %vm137_vm2, %v125_v16  ;;  %532 = vmatpush3.bf16.msra.mxu0 %v531_v33 }
  0x17   :  { %533 = vmatprep.subr.bf16.mxu1 %v569_v6  ;;  %491 = vmatprep.subr.mxu0 %v567_v2 }
  0x1a   :  { %492 = vmatpush3.msk.msra.mxu0 %vm137_vm2, %v220_v34 }
  0xd6   :  { %v112_v27 = vpop.f32.mrb[0].mxu0 }
  0xd7   :  { %v113_v28 = vadd.f32 %v410_v26, %v112_v27  ;;  %v453_v29 = vpop.f32.mrb[1].mxu0 }
  0xd9   :  { %v116_v30 = vmax.f32 %v113_v28, 0.0 }
  0xdb   :  { %473 = vmatmul.mubr.msk.f32.vlgmr.msra.gmra.mrb[0].mxu1 %vm133_vm3, %v116_v30 }
  0xdc   :  { %506 = vmatprep.mubr.msk.f32.mxu1 %vm568_vm1, %v567_v2  ;;  %535 = vmatpush3.bf16.msra.mxu1 %v534_v37 }
  0xdd   :  { %536 = vmatprep.subr.bf16.mxu1 %v569_v6 }
  0xe0   :  { %538 = vmatpush3.bf16.msra.mxu1 %v537_v45 }
  0xe1   :  { %504 = vmatprep.subr.mxu1 %v567_v2 }
  0xe4   :  { %505 = vmatpush3.msk.msra.mxu1 %vm137_vm2, %v309_v46 }
 0x1ae   :  { %v207_v39 = vpop.f32.mrb[0].mxu1 }
 0x1af   :  { %v208_v40 = vadd.f32 %v412_v38, %v207_v39  ;;  %v474_v41 = vpop.f32.mrb[1].mxu1 }
 0x1b1   :  { %v211_v42 = vmax.f32 %v208_v40, 0.0 }
 0x1b3   :  { %494 = vmatmul.mubr.msk.f32.vlgmr.msra.gmra.mrb[2].mxu0 %vm133_vm3, %v211_v42 }
 0x286   :  { %v300_v48 = vpop.f32.mrb[2].mxu0 }
 0x287   :  { %v301_v49 = vadd.f32 %v415_v47, %v300_v48  ;;  %v495_v50 = vpop.f32.mrb[3].mxu0 }
 0x289   :  { %v304_v51 = vmax.f32 %v301_v49, 0.0 }
 0x28b   :  { %507 = vmatmul.mubr.msk.f32.vlgmr.msra.gmra.mrb[2].mxu1 %vm317_vm4, %v304_v51 }
 0x35e   :  { %v390_v53 = vpop.f32.mrb[2].mxu1 }
 0x35f   :  { %v391_v54 = vadd.f32 %v418_v52, %v390_v53  ;;  %v508_v55 = vpop.f32.mrb[3].mxu1 }
 0x361   :  { %395 = vst.msk [vmem:[#allocation2] sm:$0x3] %vm394_vm5, %v391_v54 }
 0x362   :  { %554 = shalt.err (!%p551_p4)
}
 0x363   :  { %s555_s0 = scalar_lea.hbm %s746_s9, 32 }
 0x364   :  { %p556_p5 = scmp.ne.s32.totalorder %s746_s9, %s555_s0  ;;  %p559_p6 = scmp.lt.u32.totalorder %s555_s0, %s746_s9 }
 0x366   :  { %p561_p7 = pnand %p559_p6, %p556_p5 }
 0x368   :  { %564 = shalt.err (!%p561_p7)
}
 0x369   :  { %405 = dma.vmem_to_hbm [thread:$0]  %s403_s1, 32, %s746_s9, [#allocation3]  }
 0x36a   :  { %565 = dma.done.wait [#allocation3], 32  }
 0x36b   :  { %566 = vsyncadd [#allocation3], 4294967264 }
 0x36c   :  { %409 = vsyncpa [#allocation3], 1 }

</bundles_post_ra>
